<compile_context>
chip_gen: v7x
topology: tpu7x:2x2x1
jax: 0.10.0
libtpu: 0.0.40
codegen_flags: <defaults>
</compile_context>

<pallas_src>
import jax
import jax.numpy as jnp
from jax import lax
from jax.experimental import pallas as pl
from jax.experimental.pallas import tpu as pltpu


def dwconv_kernel(xc_ref, xt_ref, xb_ref, w_ref, b_ref, o_ref, xpad_ref):
    # xc_ref  : (1, TH, W, C)   centre rows of this H tile
    # xt_ref  : (1, 1, W, C)    row just above the tile (clamped at boundary)
    # xb_ref  : (1, 1, W, C)    row just below the tile (clamped at boundary)
    # w_ref   : (3, 3, C)       depthwise weights
    # b_ref   : (1, C)          bias
    # o_ref   : (1, TH, W, C)   output tile
    # xpad_ref: (TH+2, W, C)    f32 scratch holding the H-padded tile
    TH = o_ref.shape[1]
    W = o_ref.shape[2]
    C = o_ref.shape[3]

    ih = pl.program_id(1)
    n_h = pl.num_programs(1)

    # Assemble the H-padded tile in VMEM scratch.  Halo rows are zeroed at the
    # top/bottom of the image (scalar multiply instead of a data-dependent pad).
    top_scale = (ih > 0).astype(jnp.float32)
    bot_scale = (ih < n_h - 1).astype(jnp.float32)
    xpad_ref[pl.ds(1, TH)] = xc_ref[0].astype(jnp.float32)
    xpad_ref[pl.ds(0, 1)] = xt_ref[0].astype(jnp.float32) * top_scale
    xpad_ref[pl.ds(TH + 1, 1)] = xb_ref[0].astype(jnp.float32) * bot_scale

    xpad = xpad_ref[...]  # (TH+2, W, C) f32

    # W-direction neighbours via XLU rolls + edge-column masks
    # (avoids sublane-crossing slices that would materialize full VMEM copies).
    col = lax.broadcasted_iota(jnp.int32, (W, C), 0)
    x_l = jnp.where((col >= 1)[None], pltpu.roll(xpad, shift=1, axis=1), 0.0)        # x[.., w-1, ..]
    x_r = jnp.where((col <= W - 2)[None], pltpu.roll(xpad, shift=W - 1, axis=1), 0.0)  # x[.., w+1, ..]

    # Hoisted weight / bias loads.
    w = w_ref[...].astype(jnp.float32)   # (3, 3, C)
    b = b_ref[0].astype(jnp.float32)     # (C,)

    # 3x3 depthwise conv = shifted elementwise FMAs, statically unrolled.
    # Horizontal-first: combine the three W taps per kernel row over the full
    # padded tile, then add the three row-shifted partials.  Only 3 slices
    # along the (cheap, untiled) leading axis instead of 9.
    acc = jnp.zeros((TH, W, C), jnp.float32) + b[None, None, :]
    for kh in range(3):
        hrow = (x_l * w[kh, 0][None, None, :]
                + xpad * w[kh, 1][None, None, :]
                + x_r * w[kh, 2][None, None, :])
        acc = acc + hrow[kh:kh + TH]
    o_ref[0] = acc.astype(o_ref.dtype)


def _pick_tile_h(H, W, C):
    # Per-step working set ~ 10 * tile_h * W * C * 4B (double-buffered in/out
    # tiles + padded scratch + two rolled temporaries + per-row partials +
    # accumulator).  Keep it under ~4 MiB so it fits comfortably inside the
    # scoped VMEM on v5e/v6e/v7x while still amortizing the ~0.35us per-step
    # overhead.
    row_bytes = W * C * 4
    budget = 4 * 1024 * 1024
    max_th = max(1, budget // (10 * row_bytes))
    tile_h = 1
    for d in range(1, H + 1):
        if H % d == 0 and d <= max_th:
            tile_h = d
    return tile_h


def dwconv(x, weight, bias, H, W, *, tile_h=None):
    """x: (B, N, C) with N == H*W; weight: (3, 3, C); bias: (C,). Returns (B, N, C)."""
    B, N, C = x.shape
    assert N == H * W

    # (B, N, C) -> (B, H, W, C); index n = h*W + w matches PyTorch's view(B,C,H,W).
    x_nhwc = x.reshape(B, H, W, C)
    bias2d = bias.reshape(1, C)

    if tile_h is None:
        tile_h = _pick_tile_h(H, W, C)
    assert H % tile_h == 0, "tile_h must divide H"
    n_h = H // tile_h

    out_nhwc = pl.pallas_call(
        dwconv_kernel,
        out_shape=jax.ShapeDtypeStruct((B, H, W, C), x.dtype),
        grid_spec=pltpu.PrefetchScalarGridSpec(
            num_scalar_prefetch=0,
            grid=(B, n_h),
            in_specs=[
                # centre block of this H tile
                pl.BlockSpec((1, tile_h, W, C), lambda b, i: (b, i, 0, 0)),
                # single-row halos; block size 1 along H => block index == row.
                # Clamped at the image boundary; the kernel zeroes them there.
                pl.BlockSpec((1, 1, W, C),
                             lambda b, i: (b, jnp.maximum(i * tile_h - 1, 0), 0, 0)),
                pl.BlockSpec((1, 1, W, C),
                             lambda b, i: (b, jnp.minimum((i + 1) * tile_h, H - 1), 0, 0)),
                pl.BlockSpec((3, 3, C), lambda b, i: (0, 0, 0)),
                pl.BlockSpec((1, C), lambda b, i: (0, 0)),
            ],
            out_specs=pl.BlockSpec((1, tile_h, W, C), lambda b, i: (b, i, 0, 0)),
            scratch_shapes=[pltpu.VMEM((tile_h + 2, W, C), jnp.float32)],
        ),
        compiler_params=pltpu.CompilerParams(
            dimension_semantics=("parallel", "parallel"),
            vmem_limit_bytes=32 * 1024 * 1024,
        ),
    )(x_nhwc, x_nhwc, x_nhwc, weight, bias2d)

    return out_nhwc.reshape(B, N, C)


def dwconv_reference(x, weight, bias, H, W):
    """Pure-JAX reference using lax depthwise conv (NCHW like PyTorch)."""
    B, N, C = x.shape
    x_nchw = jnp.transpose(x, (0, 2, 1)).reshape(B, C, H, W)
    # weight (3,3,C) -> PyTorch depthwise layout (C, 1, 3, 3)
    w_oihw = jnp.transpose(weight, (2, 0, 1))[:, None, :, :]
    y = lax.conv_general_dilated(
        x_nchw, w_oihw, window_strides=(1, 1), padding=((1, 1), (1, 1)),
        dimension_numbers=("NCHW", "OIHW", "NCHW"), feature_group_count=C,
        precision=lax.Precision.HIGHEST)
    y = y + bias[None, :, None, None]
    return jnp.transpose(y.reshape(B, C, N), (0, 2, 1))


if __name__ == "__main__":
    key = jax.random.PRNGKey(0)
    # Small but lane-dense shapes (UNeXt uses embed dims >= 128 for DWConv).
    B, C, H, W = 2, 128, 16, 16
    N = H * W

    kx, kw, kb = jax.random.split(key, 3)
    x = jax.random.normal(kx, (B, N, C), dtype=jnp.float32)
    # Params matching nn.Conv2d(C, C, 3, groups=C, bias=True):
    # depthwise weight (C,1,3,3) stored here as (3,3,C), bias (C,).
    weight = jax.random.normal(kw, (3, 3, C), dtype=jnp.float32) * 0.1
    bias = jax.random.normal(kb, (C,), dtype=jnp.float32) * 0.1

    # Tiled over H (4 tiles of 4 rows) -> exercises the halo / boundary logic.
    out_tiled = jax.block_until_ready(dwconv(x, weight, bias, H, W, tile_h=4))
    # Auto tile size (single H tile at this toy size).
    out_auto = jax.block_until_ready(dwconv(x, weight, bias, H, W))

    ref = dwconv_reference(x, weight, bias, H, W)
    assert out_tiled.shape == (B, N, C)
    assert jnp.allclose(out_tiled, ref, atol=1e-4, rtol=1e-4), "tiled mismatch vs reference"
    assert jnp.allclose(out_auto, ref, atol=1e-4, rtol=1e-4), "auto-tile mismatch vs reference"

    print("KERNEL_OK")
</pallas_src>

<mosaic_0001>
module attributes {stable_mosaic.version = 11 : i64} {
  func.func @dwconv_kernel(%arg0: i32, %arg1: i32, %arg2: memref<1x4x16x128xf32, #tpu.memory_space<vmem>>, %arg3: memref<1x1x16x128xf32, #tpu.memory_space<vmem>>, %arg4: memref<1x1x16x128xf32, #tpu.memory_space<vmem>>, %arg5: memref<3x3x128xf32, #tpu.memory_space<vmem>>, %arg6: memref<1x128xf32, #tpu.memory_space<vmem>>, %arg7: memref<1x4x16x128xf32, #tpu.memory_space<vmem>>, %arg8: memref<6x16x128xf32, #tpu.memory_space<vmem>>) attributes {dimension_semantics = [#tpu.dimension_semantics<parallel>, #tpu.dimension_semantics<parallel>], iteration_bounds = array<i64: 2, 4>, scalar_prefetch = 0 : i64, scratch_operands = 1 : i64, tpu.core_type = #tpu.core_type<tc>, window_params = [{transform_indices = @transform_0, window_bounds = array<i64: 1, 4, 16, 128>}, {transform_indices = @transform_1, window_bounds = array<i64: 1, 1, 16, 128>}, {transform_indices = @transform_2, window_bounds = array<i64: 1, 1, 16, 128>}, {pipeline_mode = #tpu.pipeline_mode<synchronous>, transform_indices = @transform_3, window_bounds = array<i64: 3, 3, 128>}, {pipeline_mode = #tpu.pipeline_mode<synchronous>, transform_indices = @transform_4, window_bounds = array<i64: 1, 128>}, {transform_indices = @transform_5, window_bounds = array<i64: 1, 4, 16, 128>}]} {
    %c0_i32 = arith.constant 0 : i32
    %0 = arith.cmpi sgt, %arg1, %c0_i32 : i32
    %1 = arith.extui %0 : i1 to i32
    %2 = arith.sitofp %1 : i32 to f32
    %c3_i32 = arith.constant 3 : i32
    %3 = arith.cmpi slt, %arg1, %c3_i32 : i32
    %4 = arith.extui %3 : i1 to i32
    %5 = arith.sitofp %4 : i32 to f32
    %c0 = arith.constant 0 : index
    %c0_0 = arith.constant 0 : index
    %c0_1 = arith.constant 0 : index
    %c0_2 = arith.constant 0 : index
    %6 = vector.load %arg2[%c0, %c0_0, %c0_1, %c0_2] : memref<1x4x16x128xf32, #tpu.memory_space<vmem>>, vector<1x4x16x128xf32>
    %7 = vector.shape_cast %6 : vector<1x4x16x128xf32> to vector<4x16x128xf32>
    %c1 = arith.constant 1 : index
    %c0_3 = arith.constant 0 : index
    %c0_4 = arith.constant 0 : index
    %8 = vector.load %arg8[%c1, %c0_3, %c0_4] : memref<6x16x128xf32, #tpu.memory_space<vmem>>, vector<4x16x128xf32>
    tpu.vector_store %arg8[%c1, %c0_3, %c0_4], %7 {strides = array<i32>} : memref<6x16x128xf32, #tpu.memory_space<vmem>>, vector<4x16x128xf32>,
    %c0_5 = arith.constant 0 : index
    %c0_6 = arith.constant 0 : index
    %c0_7 = arith.constant 0 : index
    %c0_8 = arith.constant 0 : index
    %9 = vector.load %arg3[%c0_5, %c0_6, %c0_7, %c0_8] : memref<1x1x16x128xf32, #tpu.memory_space<vmem>>, vector<1x1x16x128xf32>
    %10 = vector.shape_cast %9 : vector<1x1x16x128xf32> to vector<1x16x128xf32>
    %11 = vector.broadcast %2 : f32 to vector<1x16x128xf32>
    %12 = arith.mulf %10, %11 : vector<1x16x128xf32>
    %c0_9 = arith.constant 0 : index
    %c0_10 = arith.constant 0 : index
    %c0_11 = arith.constant 0 : index
    %13 = vector.load %arg8[%c0_9, %c0_10, %c0_11] : memref<6x16x128xf32, #tpu.memory_space<vmem>>, vector<1x16x128xf32>
    tpu.vector_store %arg8[%c0_9, %c0_10, %c0_11], %12 {strides = array<i32>} : memref<6x16x128xf32, #tpu.memory_space<vmem>>, vector<1x16x128xf32>,
    %c0_12 = arith.constant 0 : index
    %c0_13 = arith.constant 0 : index
    %c0_14 = arith.constant 0 : index
    %c0_15 = arith.constant 0 : index
    %14 = vector.load %arg4[%c0_12, %c0_13, %c0_14, %c0_15] : memref<1x1x16x128xf32, #tpu.memory_space<vmem>>, vector<1x1x16x128xf32>
    %15 = vector.shape_cast %14 : vector<1x1x16x128xf32> to vector<1x16x128xf32>
    %16 = vector.broadcast %5 : f32 to vector<1x16x128xf32>
    %17 = arith.mulf %15, %16 : vector<1x16x128xf32>
    %c5 = arith.constant 5 : index
    %c0_16 = arith.constant 0 : index
    %c0_17 = arith.constant 0 : index
    %18 = vector.load %arg8[%c5, %c0_16, %c0_17] : memref<6x16x128xf32, #tpu.memory_space<vmem>>, vector<1x16x128xf32>
    tpu.vector_store %arg8[%c5, %c0_16, %c0_17], %17 {strides = array<i32>} : memref<6x16x128xf32, #tpu.memory_space<vmem>>, vector<1x16x128xf32>,
    %c0_18 = arith.constant 0 : index
    %c0_19 = arith.constant 0 : index
    %c0_20 = arith.constant 0 : index
    %19 = vector.load %arg8[%c0_18, %c0_19, %c0_20] : memref<6x16x128xf32, #tpu.memory_space<vmem>>, vector<6x16x128xf32>
    %20 = tpu.iota {dimensions = array<i32: 0>} : vector<16x128xi32>
    %c1_i32 = arith.constant 1 : i32
    %21 = vector.broadcast %c1_i32 : i32 to vector<16x128xi32>
    %22 = arith.cmpi sge, %20, %21 : vector<16x128xi32>
    %23 = vector.shape_cast %22 : vector<16x128xi1> to vector<1x16x128xi1>
    %c1_i32_21 = arith.constant 1 : i32
    %24 = tpu.dynamic_rotate %19 by %c1_i32_21 dim 1 : vector<6x16x128xf32>, i32 -> vector<6x16x128xf32>
    %cst = arith.constant 0.000000e+00 : f32
    %25 = vector.shape_cast %23 : vector<1x16x128xi1> to vector<1x16x128xi1>
    %26 = vector.broadcast %25 : vector<1x16x128xi1> to vector<6x16x128xi1>
    %27 = vector.broadcast %cst : f32 to vector<6x16x128xf32>
    %28 = arith.select %26, %24, %27 : vector<6x16x128xi1>, vector<6x16x128xf32>
    %c14_i32 = arith.constant 14 : i32
    %29 = vector.broadcast %c14_i32 : i32 to vector<16x128xi32>
    %30 = arith.cmpi sle, %20, %29 : vector<16x128xi32>
    %31 = vector.shape_cast %30 : vector<16x128xi1> to vector<1x16x128xi1>
    %c15_i32 = arith.constant 15 : i32
    %32 = tpu.dynamic_rotate %19 by %c15_i32 dim 1 : vector<6x16x128xf32>, i32 -> vector<6x16x128xf32>
    %cst_22 = arith.constant 0.000000e+00 : f32
    %33 = vector.shape_cast %31 : vector<1x16x128xi1> to vector<1x16x128xi1>
    %34 = vector.broadcast %33 : vector<1x16x128xi1> to vector<6x16x128xi1>
    %35 = vector.broadcast %cst_22 : f32 to vector<6x16x128xf32>
    %36 = arith.select %34, %32, %35 : vector<6x16x128xi1>, vector<6x16x128xf32>
    %c0_23 = arith.constant 0 : index
    %c0_24 = arith.constant 0 : index
    %c0_25 = arith.constant 0 : index
    %37 = vector.load %arg5[%c0_23, %c0_24, %c0_25] : memref<3x3x128xf32, #tpu.memory_space<vmem>>, vector<3x3x128xf32>
    %c0_26 = arith.constant 0 : index
    %c0_27 = arith.constant 0 : index
    %38 = vector.load %arg6[%c0_26, %c0_27] : memref<1x128xf32, #tpu.memory_space<vmem>>, vector<1x128xf32>
    %39 = vector.shape_cast %38 : vector<1x128xf32> to vector<128xf32>
    %cst_28 = arith.constant 0.000000e+00 : f32
    %40 = vector.broadcast %cst_28 : f32 to vector<4x16x128xf32>
    %41 = vector.shape_cast %39 : vector<128xf32> to vector<1x1x128xf32>
    %42 = vector.broadcast %41 : vector<1x1x128xf32> to vector<4x16x128xf32>
    %43 = arith.addf %40, %42 : vector<4x16x128xf32>
    %44 = vector.extract_strided_slice %37 {offsets = [0, 0, 0], sizes = [1, 1, 128], strides = [1, 1, 1]} : vector<3x3x128xf32> to vector<1x1x128xf32>
    %45 = vector.shape_cast %44 : vector<1x1x128xf32> to vector<128xf32>
    %46 = vector.shape_cast %45 : vector<128xf32> to vector<1x1x128xf32>
    %47 = vector.broadcast %46 : vector<1x1x128xf32> to vector<6x16x128xf32>
    %48 = arith.mulf %28, %47 : vector<6x16x128xf32>
    %49 = vector.extract_strided_slice %37 {offsets = [0, 1, 0], sizes = [1, 1, 128], strides = [1, 1, 1]} : vector<3x3x128xf32> to vector<1x1x128xf32>
    %50 = vector.shape_cast %49 : vector<1x1x128xf32> to vector<128xf32>
    %51 = vector.shape_cast %50 : vector<128xf32> to vector<1x1x128xf32>
    %52 = vector.broadcast %51 : vector<1x1x128xf32> to vector<6x16x128xf32>
    %53 = arith.mulf %19, %52 : vector<6x16x128xf32>
    %54 = arith.addf %48, %53 : vector<6x16x128xf32>
    %55 = vector.extract_strided_slice %37 {offsets = [0, 2, 0], sizes = [1, 1, 128], strides = [1, 1, 1]} : vector<3x3x128xf32> to vector<1x1x128xf32>
    %56 = vector.shape_cast %55 : vector<1x1x128xf32> to vector<128xf32>
    %57 = vector.shape_cast %56 : vector<128xf32> to vector<1x1x128xf32>
    %58 = vector.broadcast %57 : vector<1x1x128xf32> to vector<6x16x128xf32>
    %59 = arith.mulf %36, %58 : vector<6x16x128xf32>
    %60 = arith.addf %54, %59 : vector<6x16x128xf32>
    %61 = vector.extract_strided_slice %60 {offsets = [0, 0, 0], sizes = [4, 16, 128], strides = [1, 1, 1]} : vector<6x16x128xf32> to vector<4x16x128xf32>
    %62 = arith.addf %43, %61 : vector<4x16x128xf32>
    %63 = vector.extract_strided_slice %37 {offsets = [1, 0, 0], sizes = [1, 1, 128], strides = [1, 1, 1]} : vector<3x3x128xf32> to vector<1x1x128xf32>
    %64 = vector.shape_cast %63 : vector<1x1x128xf32> to vector<128xf32>
    %65 = vector.shape_cast %64 : vector<128xf32> to vector<1x1x128xf32>
    %66 = vector.broadcast %65 : vector<1x1x128xf32> to vector<6x16x128xf32>
    %67 = arith.mulf %28, %66 : vector<6x16x128xf32>
    %68 = vector.extract_strided_slice %37 {offsets = [1, 1, 0], sizes = [1, 1, 128], strides = [1, 1, 1]} : vector<3x3x128xf32> to vector<1x1x128xf32>
    %69 = vector.shape_cast %68 : vector<1x1x128xf32> to vector<128xf32>
    %70 = vector.shape_cast %69 : vector<128xf32> to vector<1x1x128xf32>
    %71 = vector.broadcast %70 : vector<1x1x128xf32> to vector<6x16x128xf32>
    %72 = arith.mulf %19, %71 : vector<6x16x128xf32>
    %73 = arith.addf %67, %72 : vector<6x16x128xf32>
    %74 = vector.extract_strided_slice %37 {offsets = [1, 2, 0], sizes = [1, 1, 128], strides = [1, 1, 1]} : vector<3x3x128xf32> to vector<1x1x128xf32>
    %75 = vector.shape_cast %74 : vector<1x1x128xf32> to vector<128xf32>
    %76 = vector.shape_cast %75 : vector<128xf32> to vector<1x1x128xf32>
    %77 = vector.broadcast %76 : vector<1x1x128xf32> to vector<6x16x128xf32>
    %78 = arith.mulf %36, %77 : vector<6x16x128xf32>
    %79 = arith.addf %73, %78 : vector<6x16x128xf32>
    %80 = vector.extract_strided_slice %79 {offsets = [1, 0, 0], sizes = [4, 16, 128], strides = [1, 1, 1]} : vector<6x16x128xf32> to vector<4x16x128xf32>
    %81 = arith.addf %62, %80 : vector<4x16x128xf32>
    %82 = vector.extract_strided_slice %37 {offsets = [2, 0, 0], sizes = [1, 1, 128], strides = [1, 1, 1]} : vector<3x3x128xf32> to vector<1x1x128xf32>
    %83 = vector.shape_cast %82 : vector<1x1x128xf32> to vector<128xf32>
    %84 = vector.shape_cast %83 : vector<128xf32> to vector<1x1x128xf32>
    %85 = vector.broadcast %84 : vector<1x1x128xf32> to vector<6x16x128xf32>
    %86 = arith.mulf %28, %85 : vector<6x16x128xf32>
    %87 = vector.extract_strided_slice %37 {offsets = [2, 1, 0], sizes = [1, 1, 128], strides = [1, 1, 1]} : vector<3x3x128xf32> to vector<1x1x128xf32>
    %88 = vector.shape_cast %87 : vector<1x1x128xf32> to vector<128xf32>
    %89 = vector.shape_cast %88 : vector<128xf32> to vector<1x1x128xf32>
    %90 = vector.broadcast %89 : vector<1x1x128xf32> to vector<6x16x128xf32>
    %91 = arith.mulf %19, %90 : vector<6x16x128xf32>
    %92 = arith.addf %86, %91 : vector<6x16x128xf32>
    %93 = vector.extract_strided_slice %37 {offsets = [2, 2, 0], sizes = [1, 1, 128], strides = [1, 1, 1]} : vector<3x3x128xf32> to vector<1x1x128xf32>
    %94 = vector.shape_cast %93 : vector<1x1x128xf32> to vector<128xf32>
    %95 = vector.shape_cast %94 : vector<128xf32> to vector<1x1x128xf32>
    %96 = vector.broadcast %95 : vector<1x1x128xf32> to vector<6x16x128xf32>
    %97 = arith.mulf %36, %96 : vector<6x16x128xf32>
    %98 = arith.addf %92, %97 : vector<6x16x128xf32>
    %99 = vector.extract_strided_slice %98 {offsets = [2, 0, 0], sizes = [4, 16, 128], strides = [1, 1, 1]} : vector<6x16x128xf32> to vector<4x16x128xf32>
    %100 = arith.addf %81, %99 : vector<4x16x128xf32>
    %c0_29 = arith.constant 0 : index
    %c0_30 = arith.constant 0 : index
    %c0_31 = arith.constant 0 : index
    %c0_32 = arith.constant 0 : index
    %101 = vector.load %arg7[%c0_29, %c0_30, %c0_31, %c0_32] : memref<1x4x16x128xf32, #tpu.memory_space<vmem>>, vector<1x4x16x128xf32>
    %102 = vector.shape_cast %101 : vector<1x4x16x128xf32> to vector<4x16x128xf32>
    %103 = vector.shape_cast %100 : vector<4x16x128xf32> to vector<1x4x16x128xf32>
    tpu.vector_store %arg7[%c0_29, %c0_30, %c0_31, %c0_32], %103 {strides = array<i32>} : memref<1x4x16x128xf32, #tpu.memory_space<vmem>>, vector<1x4x16x128xf32>,
    return
  }
  func.func @transform_0(%arg0: i32, %arg1: i32) -> (i32, i32, i32, i32) {
    %c0_i32 = arith.constant 0 : i32
    %c0_i32_0 = arith.constant 0 : i32
    %c0_i32_1 = arith.constant 0 : i32
    return %arg0, %arg1, %c0_i32, %c0_i32_0 : i32, i32, i32, i32
  }
  func.func @transform_1(%arg0: i32, %arg1: i32) -> (i32, i32, i32, i32) {
    %c4_i32 = arith.constant 4 : i32
    %0 = arith.muli %arg1, %c4_i32 : i32
    %c1_i32 = arith.constant 1 : i32
    %1 = arith.subi %0, %c1_i32 : i32
    %c0_i32 = arith.constant 0 : i32
    %2 = arith.maxsi %1, %c0_i32 : i32
    %c0_i32_0 = arith.constant 0 : i32
    %c0_i32_1 = arith.constant 0 : i32
    %c0_i32_2 = arith.constant 0 : i32
    return %arg0, %2, %c0_i32_0, %c0_i32_1 : i32, i32, i32, i32
  }
  func.func @transform_2(%arg0: i32, %arg1: i32) -> (i32, i32, i32, i32) {
    %c1_i32 = arith.constant 1 : i32
    %0 = arith.addi %arg1, %c1_i32 : i32
    %c4_i32 = arith.constant 4 : i32
    %1 = arith.muli %0, %c4_i32 : i32
    %c15_i32 = arith.constant 15 : i32
    %2 = arith.minsi %1, %c15_i32 : i32
    %c0_i32 = arith.constant 0 : i32
    %c0_i32_0 = arith.constant 0 : i32
    %c0_i32_1 = arith.constant 0 : i32
    return %arg0, %2, %c0_i32, %c0_i32_0 : i32, i32, i32, i32
  }
  func.func @transform_3(%arg0: i32, %arg1: i32) -> (i32, i32, i32) {
    %c0_i32 = arith.constant 0 : i32
    %c0_i32_0 = arith.constant 0 : i32
    %c0_i32_1 = arith.constant 0 : i32
    %c0_i32_2 = arith.constant 0 : i32
    return %c0_i32, %c0_i32_0, %c0_i32_1 : i32, i32, i32
  }
  func.func @transform_4(%arg0: i32, %arg1: i32) -> (i32, i32) {
    %c0_i32 = arith.constant 0 : i32
    %c0_i32_0 = arith.constant 0 : i32
    %c0_i32_1 = arith.constant 0 : i32
    return %c0_i32, %c0_i32_0 : i32, i32
  }
  func.func @transform_5(%arg0: i32, %arg1: i32) -> (i32, i32, i32, i32) {
    %c0_i32 = arith.constant 0 : i32
    %c0_i32_0 = arith.constant 0 : i32
    %c0_i32_1 = arith.constant 0 : i32
    return %arg0, %arg1, %c0_i32, %c0_i32_0 : i32, i32, i32, i32
  }
}

</mosaic_0001>

<bundles_post_ra>
// kernel: tpu_custom_call.1
= control target key start
LH: loop header
LB: loop body
LE: loop exit
PB: predicated region body
PF: predicated region fallthrough
CT: control target
= control target key end

     0   :  { %s2216_s0 = inlined_call_operand.hbm [shape: f32[2,16,16,128], index: 0, kind: input, shape index: {}]   ;;  %s2217_s1 = inlined_call_operand.hbm [shape: f32[2,16,16,128], index: 1, kind: input, shape index: {}]   ;;  %s2218_s2 = inlined_call_operand.hbm [shape: f32[2,16,16,128], index: 2, kind: input, shape index: {}]   ;;  %s2219_s3 = inlined_call_operand.hbm [shape: f32[3,3,128], index: 3, kind: input, shape index: {}]   ;;  %s2220_s4 = inlined_call_operand.vmem [shape: f32[1,128], index: 4, kind: input, shape index: {}]   ;;  %s2221_s5 = inlined_call_operand.hbm [shape: f32[2,16,16,128], index: 5, kind: output, shape index: {}]  }
   0x1   :  { %2248 = sst [smem:[#allocation33_spill]] %s2216_s0 }
   0x2   :  { %2249 = sst [smem:[#allocation34_spill]] %s2217_s1 }
   0x3   :  { %2250 = sst [smem:[#allocation35_spill]] %s2218_s2 }
   0x4   :  { %2251 = sst [smem:[#allocation36_spill]] %s2219_s3 }
   0x5   :  { %2252 = sst [smem:[#allocation37_spill]] %s2220_s4 }
   0x6   :  { %2253 = sst [smem:[#allocation38_spill]] %s2221_s5 }
   0x7   :  { %10 = vsyncpa [#allocation4], 0 }
   0x8   :  { %12 = vsyncpa [#allocation4 + $0x1], 0 }
   0x9   :  { %13 = vsyncpa [#allocation7], 0 }
   0xa   :  { %15 = vsyncpa [#allocation7 + $0x1], 0 }
   0xb   :  { %16 = vsyncpa [#allocation10], 0 }
   0xc   :  { %17 = vsyncpa [#allocation5], 0 }
   0xd   :  { %19 = vsyncpa [#allocation5 + $0x1], 0  ;;  %s1421_s18 = smov 0   ;;  %s1423_s19 = smov 0  }
   0xe   :  { %s1425_s20 = smov 0   ;;  %s1427_s21 = smov 0  }
   0xf   :  { %s1429_s22 = smov 0   ;;  %s1431_s23 = smov 0  }
  0x10   :  { %s1433_s24 = smov 0   ;;  %s1435_s25 = smov 0  }
  0x11   :  { %s1437_s26 = smov 0   ;;  %s1439_s27 = smov 0  }
  0x12   :  { %s1441_s28 = smov 0   ;;  %s1443_s29 = smov 0  }
  0x13   :  { %s1445_s30 = smov 0   ;;  %s1447_s6 = smov 0  }
  0x14 LB: > { %2254 = sst [smem:[#allocation17_spill]] %s1326_s18  ;;  %s34_s7 = sadd.s32 1, %s1370_s29  ;;  %s1378_s6 = sphi %s1447_s6, %s25_s6   ;;  %s1374_s30 = sphi %s1445_s30, %s2326_s30   ;;  %s1370_s29 = sphi %s1443_s29, %s2325_s29   ;;  %s1366_s28 = sphi %s1441_s28, %s2324_s28   ;;  %s1362_s27 = sphi %s1439_s27, %s2323_s27   ;;  %s1358_s26 = sphi %s1437_s26, %s2322_s26   ;;  %s1354_s25 = sphi %s1435_s25, %s2331_s25   ;;  %s1350_s24 = sphi %s1433_s24, %s2330_s24   ;;  %s1346_s23 = sphi %s1431_s23, %s2320_s23   ;;  %s1342_s22 = sphi %s1429_s22, %s2329_s22   ;;  %s1338_s21 = sphi %s1427_s21, %s2328_s21   ;;  %s1334_s20 = sphi %s1425_s20, %s2327_s20   ;;  %s1330_s19 = sphi %s1423_s19, %s2318_s19   ;;  %s1326_s18 = sphi %s1421_s18, %s2317_s18  }
  0x15   : > { %2255 = sst [smem:[#allocation18_spill]] %s1330_s19  ;;  %s37_s8 = sadd.s32 1, %s1374_s30 }
  0x16   : > { %2256 = sst [smem:[#allocation19_spill]] %s1334_s20  ;;  %p35_p0 = scmp.ge.s32.totalorder %s34_s7, 4 }
  0x17   : > { %2257 = sst [smem:[#allocation20_spill]] %s1346_s23  ;;  %p2233_p1 = scmp.eq.s32.totalorder %s1378_s6, 0 }
  0x18   : > { %2258 = sst [smem:[#allocation21_spill]] %s1358_s26  ;;  %s902_s9 = sshll.u32 %s1370_s29, 2 }
  0x19   : > { %2259 = sst [smem:[#allocation22_spill]] %s1362_s27  ;;  %s82_s10 = sadd.s32 1, %s1346_s23 }
  0x1a   : > { %2260 = sst [smem:[#allocation23_spill]] %s1366_s28  ;;  %s2333_s7 = smov (%p35_p0, %s34_s7), 0 }
  0x1b   : > { %2261 = sst [smem:[#allocation24_spill]] %s1370_s29  ;;  %s2335_s8 = smov (!%p35_p0, %s37_s8), %s1374_s30 }
  0x1c   : > { %2262 = sst [smem:[#allocation25_spill]] %s1374_s30  ;;  %s42_s11 = ssub.s32 %s1370_s29, %s2333_s7 }
  0x1d   : > { %2263 = sst [smem:[#allocation26_spill]] %s2333_s7  ;;  %s903_s12 = sadd.s32 4294967295, %s902_s9 }
  0x1e   : > { %p39_p2 = scmp.ge.s32.totalorder %s2335_s8, 2  ;;  %p71_p3 = scmp.gt.s32.totalorder %s903_s12, 0 }
  0x1f   : > { %s904_s13 = sshll.u32 %s2333_s7, 2  ;;  %p89_p4 = scmp.ne.s32.totalorder %s1346_s23, %s1342_s22 }
  0x20   : > { %s2337_s8 = smov (%p39_p2, %s2335_s8), 0  ;;  %s2339_s12 = smov (!%p71_p3, %s903_s12), 0 }
  0x21   : > { %2264 = sst [smem:[#allocation27_spill]] %s2337_s8  ;;  %s1508_s14 = ssub.s32 %s1374_s30, %s2337_s8 }
  0x22   : > { %2265 = sst [smem:[#allocation28_spill]] %s1508_s14  ;;  %s905_s15 = sadd.s32 4294967295, %s904_s13 }
  0x23   : > { %s1511_s16 = sor.u32 %s42_s11, %s1508_s14  ;;  %p75_p5 = scmp.gt.s32.totalorder %s905_s15, 0 }
  0x24   : > { %p1516_p7 = por %p89_p4, %p2233_p1  ;;  %p95_p8 = scmp.ne.s32.totalorder %s1342_s22, %s1338_s21 }
  0x25   : > { %s2341_s15 = smov (!%p75_p5, %s905_s15), 0  ;;  %s1522_s8 = sadd.s32 4, %s902_s9 }
  0x26   : > { %2267 = sst [smem:[#allocation29_spill]] %s1522_s8  ;;  %s78_s7 = ssub.s32 %s2339_s12, %s2341_s15 }
  0x27   : > { %s79_s5 = sor.u32 %s78_s7, %s1508_s14  ;;  %s1526_s11 = sadd.s32 4, %s904_s13 }
  0x28   : > { %p80_p10 = scmp.eq.s32.totalorder %s79_s5, 0  ;;  %p2232_p12 = scmp.lt.s32.totalorder %s1378_s6, 8 }
  0x29   : > { %s1534_s4 = sshll.u32 %s1374_s30, 5  ;;  %s265_s27 = sand.u32 1, %s1378_s6  }
  0x2a   : > { %s1531_s28 = scalar_select %p80_p10, %s1346_s23, %s82_s10  }
  0x2b   : > { %s267_s9 = sand.u32 1, %s1346_s23   ;;  %s919_s18 = sshll.u32 %s2339_s12, 1 }
  0x2c   : > { %2268 = sst [smem:[#allocation30_spill]] %s1531_s28  ;;  %s916_s2 = sshll.u32 %s267_s9, 4 }
  0x2d   : > { %s279_s15 = sadd.s32 %s919_s18, %s1534_s4  ;;  %s269_s7 = scalar_lea.vmem [#allocation6], %s916_s2 }
  0x2e   : > { %s921_s19 = sshll.u32 %s279_s15, 7  ;;  %s282_s13 = sshll.u32 %s269_s7, 4  ;;  %s1544_s13 = int_to_ptr.vmem [resolvable:$true] %s282_s13 }
  0x2f   : > { %s2269_s1 = sld [smem:[#allocation34_spill]]  ;;  %p1550_p13 = pnand %p2232_p12, %p1516_p7 }
  0x30   : > { %s1554_s2 = scalar_lea.sflag [#allocation7], %s265_s27 }
  0x31   : > { %p1104_p2 = pneg %p1550_p13 }
  0x35   : > { %s1542_s20 = scalar_lea.hbm %s2269_s1, %s921_s19  ;;  %s1107_s10 = scalar_lea.hbm %s2269_s1, 8192 }
  0x36   : > { %s1102_s18 = scalar_lea.hbm %s1542_s20, 256  ;;  %p1108_p5 = scmp.lt.u32.totalorder %s1542_s20, %s2269_s1 }
  0x37   : > { %p1103_p0 = scmp.ne.s32.totalorder %s1542_s20, %s1102_s18  ;;  %p1109_p7 = scmp.lt.u32.totalorder %s1107_s10, %s1102_s18 }
  0x38   : > { %p1111_p11 = scmp.lt.u32.totalorder %s1102_s18, %s1542_s20 }
  0x39   : > { %p1105_p3 = pnand %p1104_p2, %p1103_p0  ;;  %p1110_p10 = por %p1109_p7, %p1108_p5 }
  0x3b   : > { %p1106_p4 = pneg %p1105_p3  ;;  %p1112_p9 = por %p1111_p11, %p1110_p10 }
  0x3d   : > { %p1113_p12 = pnand %p1112_p9, %p1106_p4 }
  0x3f   : > { %1116 = shalt.err (!%p1113_p12)
}
  0x40   : > { %s1117_s27 = scalar_lea.vmem %s1544_s13, 256  ;;  %s1380_s17 = smov [#allocation6]  }
  0x41   : > { %p1118_p0 = scmp.ne.s32.totalorder %s1544_s13, %s1117_s27  ;;  %s1122_s9 = sshll.u32 %s1380_s17, 4  ;;  %s1123_s9 = int_to_ptr.vmem [resolvable:$false] %s1122_s9 }
  0x42   : > { %s1124_s15 = scalar_lea.vmem %s1123_s9, 512  ;;  %p1125_p6 = scmp.lt.s32.totalorder %s1544_s13, %s1123_s9 }
  0x43   : > { %p1120_p3 = pnand %p1118_p0, %p1104_p2  ;;  %p1126_p5 = scmp.lt.s32.totalorder %s1124_s15, %s1117_s27 }
  0x45   : > { %p1121_p1 = pneg %p1120_p3  ;;  %p1127_p7 = por %p1126_p5, %p1125_p6 }
  0x47   : > { %p1128_p11 = pnand %p1127_p7, %p1121_p1 }
  0x49   : > { %1131 = shalt.err (!%p1128_p11)
}
  0x4a   : > { %s2237_s7 = smov 128   ;;  %s2239_s18 = smov 8  }
  0x4b   : > { %971 = dma.hbm_to_vmem [thread:$0]  (!%p1550_p13), %s1542_s20, 256, %s1544_s13, %s1554_s2, %s2237_s7, %s2237_s7, %s2239_s18  }
  0x4c   : > { %s1586_s19 = sadd.s32 4294967295, %s1378_s6   ;;  %p908_p1 = scmp.ge.s32.totalorder %s1378_s6, 1 }
  0x4d   : > { %p2234_p6 = scmp.eq.s32.totalorder %s1586_s19, 0  ;;  %p212_p12 = scmp.lt.s32.totalorder %s1378_s6, 9 }
  0x4e   : > { %s1383_s20 = smov [#allocation9]   ;;  %s2274_s3 = sld [smem:[#allocation36_spill]] }
  0x4f   : > { %p1597_p2 = por %p95_p8, %p2234_p6  ;;  %p1601_p4 = pnand %p908_p1, %p212_p12 }
  0x50   : > { %s224_s13 = sshll.u32 %s1383_s20, 4  ;;  %s225_s13 = int_to_ptr.vmem [resolvable:$true] %s224_s13 }
  0x51   : > { %s2271_s8 = scalar_select %p1597_p2, 1, 0 }
  0x52   : > { %s2272_s5 = scalar_select %p1601_p4, 1, 0 }
  0x53   : > { %p961_p13 = pneg %p1601_p4 }
  0x54   : > { %s1132_s14 = scalar_lea.hbm %s2274_s3, 192 }
  0x55   : > { %p1609_p10 = pnand %p961_p13, %p2234_p6  ;;  %p1133_p8 = scmp.ne.s32.totalorder %s2274_s3, %s1132_s14 }
  0x56   : > { %p1139_p7 = scmp.lt.u32.totalorder %s1132_s14, %s2274_s3 }
  0x57   : > { %p1134_p0 = pneg %p1609_p10 }
  0x59   : > { %p1135_p3 = pnand %p1134_p0, %p1133_p8 }
  0x5b   : > { %p1136_p5 = pneg %p1135_p3 }
  0x5d   : > { %p1141_p11 = pnand %p1139_p7, %p1136_p5 }
  0x5f   : > { %1144 = shalt.err (!%p1141_p11)
}
  0x60   : > { %s1145_s20 = scalar_lea.vmem %s225_s13, 192  ;;  %p1153_p9 = scmp.lt.s32.totalorder %s225_s13, %s225_s13 }
  0x61   : > { %p1146_p1 = scmp.ne.s32.totalorder %s225_s13, %s1145_s20  ;;  %p1154_p6 = scmp.lt.s32.totalorder %s1145_s20, %s1145_s20 }
  0x63   : > { %p1148_p12 = pnand %p1146_p1, %p1134_p0  ;;  %p1155_p2 = por %p1154_p6, %p1153_p9 }
  0x65   : > { %p1149_p13 = pneg %p1148_p12 }
  0x67   : > { %p1156_p4 = pnand %p1155_p2, %p1149_p13 }
  0x69   : > { %1159 = shalt.err (!%p1156_p4)
}
  0x6a   : > { %s1384_s21 = smov 64   ;;  %s1385_s12 = smov 4  }
  0x6b   : > { %964 = dma.hbm_to_vmem [thread:$0]  (!%p1609_p10), %s2274_s3, 192, %s225_s13, [#allocation10], %s1384_s21, %s1384_s21, %s1385_s12  }
  0x6c   : > { %s901_s17 = sadd.s32 4294967294, %s1378_s6   ;;  %s46_s9 = sadd.s32 1, %s1358_s26 }
  0x6d   : > { %p2275_p6 = scmp.eq.s32.totalorder %s1511_s16, 0  ;;  %p53_p9 = scmp.ne.s32.totalorder %s1358_s26, %s1354_s25 }
  0x6e   : > { %p59_p2 = scmp.ne.s32.totalorder %s1354_s25, %s1350_s24  ;;  %p205_p4 = scmp.eq.s32.totalorder %s901_s17, 7 }
  0x6f   : > { %s1634_s15 = scalar_select %p2275_p6, %s1358_s26, %s46_s9  }
  0x70   : > { %s241_s20 = sand.u32 1, %s1358_s26   ;;  %p2277_p8 = scmp.eq.s32.totalorder %s1378_s6, 0 }
  0x71   : > { %2276 = sst [smem:[#allocation31_spill]] %s1634_s15  ;;  %p2278_p3 = scmp.eq.s32.totalorder %s1586_s19, 0 }
  0x72   : > { %p55_p0 = por %p2277_p8, %p53_p9  ;;  %p2280_p7 = scmp.eq.s32.totalorder %s1586_s19, 7 }
  0x73   : > { %p1645_p5 = por %p2278_p3, %p59_p2  ;;  %p1655_p10 = por %p205_p4, %p59_p2 }
  0x74   : > { %p1651_p11 = por %p2280_p7, %p53_p9  ;;  %s911_s10 = sshll.u32 %s241_s20, 6 }
  0x75   : > { %s2282_s16 = scalar_select %p1655_p10, 1, 0 }
  0x76   : > { %s2281_s13 = scalar_select %p1651_p11, 1, 0 }
  0x77   : > { %2283 = sst [smem:[#allocation32_spill]] %s2282_s16  ;;  %s945_s21 = sshll.u32 %s1370_s29, 3 }
  0x78   : > { %s252_s12 = sadd.s32 %s945_s21, %s1534_s4  ;;  %s245_s14 = scalar_lea.vmem [#allocation3], %s911_s10 }
  0x79   : > { %s255_s27 = sshll.u32 %s245_s14, 4  ;;  %s915_s17 = sshll.u32 %s252_s12, 7  ;;  %s1661_s27 = int_to_ptr.vmem [resolvable:$true] %s255_s27 }
  0x7a   : > { %s2284_s0 = sld [smem:[#allocation33_spill]]  ;;  %p2285_p1 = scmp.lt.s32.totalorder %s1378_s6, 8 }
  0x7b   : > { %s1674_s10 = scalar_lea.sflag [#allocation4], %s241_s20 }
  0x7c   : > { %p1670_p12 = pnand %p2285_p1, %p55_p0 }
  0x7e   : > { %p1162_p6 = pneg %p1670_p12 }
  0x80   : > { %s1666_s1 = scalar_lea.hbm %s2284_s0, %s915_s17  ;;  %s1165_s14 = scalar_lea.hbm %s2284_s0, 8192 }
  0x81   : > { %s1160_s21 = scalar_lea.hbm %s1666_s1, 1024  ;;  %p1166_p4 = scmp.lt.u32.totalorder %s1666_s1, %s2284_s0 }
  0x82   : > { %p1161_p13 = scmp.ne.s32.totalorder %s1666_s1, %s1160_s21  ;;  %p1167_p8 = scmp.lt.u32.totalorder %s1165_s14, %s1160_s21 }
  0x83   : > { %p1169_p3 = scmp.lt.u32.totalorder %s1160_s21, %s1666_s1 }
  0x84   : > { %p1163_p9 = pnand %p1162_p6, %p1161_p13  ;;  %p1168_p0 = por %p1167_p8, %p1166_p4 }
  0x86   : > { %p1164_p2 = pneg %p1163_p9  ;;  %p1170_p7 = por %p1169_p3, %p1168_p0 }
  0x88   : > { %p1171_p1 = pnand %p1170_p7, %p1164_p2 }
  0x8a   : > { %1174 = shalt.err (!%p1171_p1)
}
  0x8b   : > { %s1175_s20 = scalar_lea.vmem %s1661_s27, 1024  ;;  %s1386_s18 = smov [#allocation3]  }
  0x8c   : > { %p1176_p13 = scmp.ne.s32.totalorder %s1661_s27, %s1175_s20  ;;  %s1180_s12 = sshll.u32 %s1386_s18, 4  ;;  %s1181_s12 = int_to_ptr.vmem [resolvable:$false] %s1180_s12 }
  0x8d   : > { %s1182_s17 = scalar_lea.vmem %s1181_s12, 2048  ;;  %p1183_p11 = scmp.lt.s32.totalorder %s1661_s27, %s1181_s12 }
  0x8e   : > { %p1178_p9 = pnand %p1176_p13, %p1162_p6  ;;  %p1184_p4 = scmp.lt.s32.totalorder %s1182_s17, %s1175_s20 }
  0x90   : > { %p1179_p10 = pneg %p1178_p9  ;;  %p1185_p8 = por %p1184_p4, %p1183_p11 }
  0x92   : > { %p1186_p0 = pnand %p1185_p8, %p1179_p10 }
  0x94   : > { %1189 = shalt.err (!%p1186_p0)
}
  0x95   : > { %s2287_s21 = smov 8   ;;  %s2288_s14 = smov 128  }
  0x96   : > { %s2289_s9 = sld [smem:[#allocation19_spill]]  ;;  %s2290_s0 = sld [smem:[#allocation29_spill]] }
  0x97   : > { %s2291_s18 = sld [smem:[#allocation18_spill]]  ;;  %s2292_s12 = sld [smem:[#allocation17_spill]] }
  0x98   : > { %s2293_s20 = sld [smem:[#allocation28_spill]]  ;;  %p2295_p10 = scmp.lt.s32.totalorder %s1526_s11, 15 }
  0x99   : > { %968 = dma.hbm_to_vmem [thread:$0]  (!%p1670_p12), %s1666_s1, 1024, %s1661_s27, %s1674_s10, %s2288_s14, %s2288_s14, %s2287_s21  }
  0x9a   : > { %s2345_s11 = smov (!%p2295_p10, %s1526_s11), 15  ;;  %p2296_p3 = scmp.eq.s32.totalorder %s1378_s6, 0 }
  0x9b   : > { %p2297_p13 = scmp.eq.s32.totalorder %s1586_s19, 0  ;;  %s2299_s23 = sld [smem:[#allocation35_spill]] }
  0x9c   : > { %s118_s3 = sadd.s32 1, %s2289_s9  ;;  %p2294_p11 = scmp.lt.s32.totalorder %s2290_s0, 15 }
  0x9d   : > { %p125_p6 = scmp.ne.s32.totalorder %s2289_s9, %s2291_s18  ;;  %p131_p2 = scmp.ne.s32.totalorder %s2291_s18, %s2292_s12 }
  0x9e   : > { %s2343_s0 = smov (!%p2294_p11, %s2290_s0), 15  ;;  %s294_s30 = sand.u32 1, %s2289_s9  }
  0x9f   : > { %s114_s17 = ssub.s32 %s2343_s0, %s2345_s11  ;;  %p127_p7 = por %p125_p6, %p2296_p3 }
  0xa0   : > { %s115_s29 = sor.u32 %s114_s17, %s2293_s20  ;;  %p1722_p9 = por %p131_p2, %p2297_p13 }
  0xa1   : > { %p116_p1 = scmp.eq.s32.totalorder %s115_s29, 0  ;;  %s922_s1 = sshll.u32 %s294_s30, 4 }
  0xa2   : > { %s2298_s15 = scalar_select %p1722_p9, 1, 0 }
  0xa3   : > { %s924_s27 = sshll.u32 %s2343_s0, 1  ;;  %s2347_s9 = smov (!%p116_p1, %s2289_s9), %s118_s3 }
  0xa4   : > { %s306_s10 = sadd.s32 %s924_s27, %s1534_s4  ;;  %s296_s28 = scalar_lea.vmem [#allocation8], %s922_s1 }
  0xa5   : > { %s926_s26 = sshll.u32 %s306_s10, 7  ;;  %s309_s18 = sshll.u32 %s296_s28, 4  ;;  %s1735_s18 = int_to_ptr.vmem [resolvable:$true] %s309_s18 }
  0xa6   : > { %s2300_s16 = smov %s2299_s23  ;;  %s1733_s20 = scalar_lea.hbm %s2299_s23, %s926_s26 }
  0xa7   : > { %p2301_p12 = scmp.lt.s32.totalorder %s1378_s6, 8  ;;  %s1190_s4 = scalar_lea.hbm %s1733_s20, 256 }
  0xa8   : > { %p1191_p8 = scmp.ne.s32.totalorder %s1733_s20, %s1190_s4  ;;  %s1195_s28 = scalar_lea.hbm %s2300_s16, 8192 }
  0xa9   : > { %p1739_p4 = pnand %p2301_p12, %p127_p7  ;;  %p1196_p6 = scmp.lt.u32.totalorder %s1733_s20, %s2300_s16 }
  0xaa   : > { %p1197_p2 = scmp.lt.u32.totalorder %s1195_s28, %s1190_s4  ;;  %p1199_p7 = scmp.lt.u32.totalorder %s1190_s4, %s1733_s20 }
  0xab   : > { %p1192_p0 = pneg %p1739_p4 }
  0xac   : > { %p1198_p3 = por %p1197_p2, %p1196_p6 }
  0xad   : > { %p1193_p11 = pnand %p1192_p0, %p1191_p8 }
  0xae   : > { %p1200_p1 = por %p1199_p7, %p1198_p3 }
  0xaf   : > { %p1194_p10 = pneg %p1193_p11 }
  0xb1   : > { %p1201_p13 = pnand %p1200_p1, %p1194_p10 }
  0xb3   : > { %1204 = shalt.err (!%p1201_p13)
}
  0xb4   : > { %s1205_s3 = scalar_lea.vmem %s1735_s18, 256  ;;  %s1387_s17 = smov [#allocation8]  }
  0xb5   : > { %p1206_p12 = scmp.ne.s32.totalorder %s1735_s18, %s1205_s3  ;;  %s1210_s1 = sshll.u32 %s1387_s17, 4  ;;  %s1211_s1 = int_to_ptr.vmem [resolvable:$false] %s1210_s1 }
  0xb6   : > { %s1212_s27 = scalar_lea.vmem %s1211_s1, 512  ;;  %p1213_p9 = scmp.lt.s32.totalorder %s1735_s18, %s1211_s1 }
  0xb7   : > { %p1208_p8 = pnand %p1206_p12, %p1192_p0  ;;  %p1214_p6 = scmp.lt.s32.totalorder %s1212_s27, %s1205_s3 }
  0xb9   : > { %p1209_p11 = pneg %p1208_p8  ;;  %p1215_p2 = por %p1214_p6, %p1213_p9 }
  0xbb   : > { %p1216_p3 = pnand %p1215_p2, %p1209_p11 }
  0xbd   : > { %1219 = shalt.err (!%p1216_p3)
}
  0xbe   : > { %974 = dma.hbm_to_vmem [thread:$0]  (!%p1739_p4), %s1733_s20, 256, %s1735_s18, %s1554_s2, %s2288_s14, %s2288_s14, %s2287_s21  }
  0xbf   : > { %p2303_p0 = scmp.ne.s32.totalorder %s2272_s5, 0 }
  0xc0   : > { %s1775_s10 = sand.u32 (!%p2303_p0), 1, %s1354_s25  }
  0xc1   : > { %321 = sbr.rel (%p2303_p0) target bundleno = 299 (0x12b), region = 40  ;;  %s928_s12 = sshll.u32 (!%p2303_p0), %s1775_s10, 6 }
  0xc2   : > { %s324_s11 = scalar_lea.sflag (!%p2303_p0), [#allocation4], %s1775_s10  ;;  %s1781_s0 = scalar_lea.vmem (!%p2303_p0), [#allocation3], %s928_s12 }
  0xc8   : > { %1305 = dma.done.wait (%p1645_p5), %s324_s11, 1024  }
  0xc9   : > { %1307 = vsyncadd (%p1645_p5), %s324_s11, 4294966272  ;;  %s332_s2 = sand.u32 1, %s1586_s19   ;;  %s334_s5 = sand.u32 1, %s1342_s22  }
  0xca   : > { %s1789_s21 = sshll.u32 %s334_s5, 4  ;;  %s333_s14 = scalar_lea.sflag [#allocation7], %s332_s2 }
  0xcb   : > { %s336_s18 = scalar_lea.vmem [#allocation6], %s1789_s21  ;;  %p2304_p9 = scmp.ne.s32.totalorder %s2271_s8, 0 }
  0xcd   : > { %1309 = dma.done.wait (%p2304_p9), %s333_s14, 256  }
  0xce   : > { %1311 = vsyncadd (%p2304_p9), %s333_s14, 4294967040  ;;  %s2305_s20 = sld [smem:[#allocation18_spill]]  ;;  %p2306_p5 = scmp.ne.s32.totalorder %s2298_s15, 0 }
  0xd4   : > { %s343_s4 = sand.u32 1, %s2305_s20  }
  0xd5   : > { %s1797_s7 = sshll.u32 %s343_s4, 4 }
  0xd6   : > { %s345_s23 = scalar_lea.vmem [#allocation8], %s1797_s7 }
  0xd7   : > { %1313 = dma.done.wait (%p2306_p5), %s333_s14, 256  }
  0xd8   : > { %1315 = vsyncadd (%p2306_p5), %s333_s14, 4294967040  ;;  %p2307_p4 = scmp.eq.s32.totalorder %s1586_s19, 0 }
  0xda   : > { %1317 = dma.done.wait (%p2307_p4), [#allocation10], 192   ;;  %p2308_p10 = pmov %p2307_p4 }
  0xdb   : > { %s2309_s8 = sld [smem:[#allocation22_spill]]  ;;  %v446_v0 = vlaneseq  ;;  %v1818_v4 = vld [vmem:[%s1781_s0] sm:$0xff]  ;;  %v1821_v5 = vld [vmem:[%s1781_s0 + $0x8] sm:$0xff]  ;;  %v1824_v6 = vld [vmem:[%s1781_s0 + $0x10] sm:$0xff]  ;;  %s2310_s29 = sld [smem:[#allocation37_spill]] }
  0xdc   : > { %1319 = vsyncadd (%p2308_p10), [#allocation10], 4294967104  ;;  %v1830_v10 = vld [vmem:[%s1781_s0 + $0x18] sm:$0xff]  ;;  %v419_v11 = vld [vmem:[%s336_s18] sm:$0xff]  ;;  %v452_v13 = vrot.slane %v1818_v4, 7  ;;  %v453_v14 = vrot.slane %v1824_v6, 7 }
  0xdd   : > { %v1809_v1 = vshrl.u32 %v446_v0, 7  ;;  %v420_v12 = vld [vmem:[%s336_s18 + $0x8] sm:$0xff]  ;;  %v458_v15 = vrot.slane %v1821_v5, 7  ;;  %v459_v18 = vrot.slane %v1830_v10, 7  ;;  %v495_v19 = vrot.slane %v1818_v4, 1  ;;  %s1952_s30 = scalar_lea.vmem [#allocation11], %s928_s12 }
  0xde   : > { %v496_v21 = vrot.slane %v1824_v6, 1  ;;  %v501_v22 = vrot.slane %v1821_v5, 1  ;;  %v502_v23 = vrot.slane %v1830_v10, 1  ;;  %v535_v24 = vld [vmem:[#allocation9] sm:$0x7]  ;;  %s2311_s1 = sld [smem:[#allocation23_spill]] }
  0xdf   : > { %vm449_vm0 = vcmp.ge.s32.totalorder %v1809_v1, 1  ;;  %vm463_vm1 = vcmp.lt.s32.totalorder %v1809_v1, 1  ;;  %vm506_vm2 = vcmp.lt.s32.totalorder %v1809_v1, 7  ;;  %v1815_v3 = vadd.s32 8, %v1809_v1  ;;  %v536_v29 = vld [vmem:[#allocation9 + $0x4] sm:$0x7] }
  0xe0   : > { %v548_v7 = vsub.s32 0, %v1809_v1  ;;  %v560_v8 = vsub.s32 1, %v1809_v1  ;;  %v580_v9 = vsub.s32 2, %v1809_v1  ;;  %v471_v20 = vsel %vm463_vm1, %v458_v15, %v452_v13  ;;  %v537_v36 = vld [vmem:[#allocation9 + $0x8] sm:$0x7]  ;;  %s2312_s14 = sld [smem:[#allocation38_spill]] }
  0xe1   : > { %p396_p7 = scmp.gt.s32.totalorder %s2309_s8, 0  ;;  %vm493_vm3 = vcmp.le.s32.totalorder %v1815_v3, 14  ;;  %v472_v27 = vsel %vm463_vm1, %v459_v18, %v453_v14  ;;  %v1847_v28 = vsel %vm449_vm0, %v471_v20, 0.0  ;;  %v1855_v33 = vsel %vm506_vm2, %v495_v19, %v501_v22  ;;  %v1897_v55 = vld [vmem:[%s2310_s29] ss:$0 sm:$0xff]  ;;  %p399_p1 = scmp.lt.s32.totalorder %s2309_s8, 3 }
  0xe2   : > { %v1851_v30 = vsel %vm449_vm0, %v472_v27, 0.0  ;;  %v1861_v35 = vsel %vm506_vm2, %v496_v21, %v502_v23  ;;  %v1863_v37 = vrot.slane %v535_v24, %v548_v7  ;;  %v1865_v38 = vrot.slane %v535_v24, %v560_v8  ;;  %s948_s27 = sshll.u32 %s2309_s8, 3  ;;  %s735_s20 = scalar_lea.sflag [#allocation5], %s1775_s10 }
  0xe3   : > { %s397_s26 = scalar_select %p396_p7, 1, 0  ;;  %v1871_v41 = vrot.slane %v535_v24, %v580_v9  ;;  %v1873_v42 = vrot.slane %v536_v29, %v548_v7  ;;  %v1877_v45 = vrot.slane %v536_v29, %v560_v8  ;;  %v1879_v46 = vrot.slane %v536_v29, %v580_v9  ;;  %v1938_v24 = vld [vmem:[%s1781_s0 + $0x28] sm:$0xff] }
  0xe4   : > { %v1884_v49 = vrot.slane %v537_v36, %v548_v7  ;;  %v1886_v50 = vrot.slane %v537_v36, %v560_v8  ;;  %v1892_v54 = vrot.slane %v537_v36, %v580_v9  ;;  %v465_v59 = vsel %vm463_vm1, %v452_v13, %v458_v15  ;;  %s2040_s3 = scalar_select %p399_p1, 1, 0 }
  0xe5   : > { %s398_s28 = scvt.s32.f32 %s397_s26  ;;  %v610_v48 = vmul.f32 %v1873_v42, %v1847_v28  ;;  %v622_v52 = vmul.f32 %v1877_v45, %v1818_v4  ;;  %v642_v53 = vmul.f32 %v1879_v46, %v1855_v33  ;;  %v1911_v63 = vsel %vm463_vm1, %v453_v14, %v459_v18  ;;  %s937_s12 = sshll.u32 %s2311_s1, 5 }
  0xe6   : > { %v670_v56 = vmul.f32 %v1884_v49, %v1851_v30  ;;  %v682_v57 = vmul.f32 %v1886_v50, %v1824_v6  ;;  %v702_v62 = vmul.f32 %v1892_v54, %v1861_v35  ;;  %v514_v7 = vsel %vm506_vm2, %v501_v22, %v495_v19  ;;  %v1931_v19 = vld [vmem:[%s1781_s0 + $0x20] sm:$0xff]  ;;  %s401_s17 = scvt.s32.f32 %s2040_s3  ;;  %s748_s11 = sadd.s32 %s948_s27, %s937_s12 }
  0xe7   : > { %v421_v2 = vstv %s398_s28  ;;  %v630_v61 = vadd.f32 %v622_v52, %v610_v48  ;;  %v515_v8 = vsel %vm506_vm2, %v502_v23, %v496_v21  ;;  %v526_v13 = vsel %vm493_vm3, %v514_v7, 0.0  ;;  %s938_s2 = sshll.u32 %s748_s11, 7  ;;  %p2313_p12 = scmp.ne.s32.totalorder %s2281_s13, 0 }
  0xe8   : > { %v422_v16 = vmul.f32 %v421_v2, %v419_v11  ;;  %v423_v17 = vmul.f32 %v421_v2, %v420_v12  ;;  %v690_v0 = vadd.f32 %v682_v57, %v670_v56  ;;  %v1926_v15 = vsel %vm493_vm3, %v515_v8, 0.0  ;;  %s2137_s18 = scalar_lea.hbm %s2312_s14, %s938_s2  ;;  %s1388_s7 = smov [#allocation11]  }
  0xe9   : > { %v650_v11 = vadd.f32 %v642_v53, %v630_v61  ;;  %v611_v22 = vmul.f32 %v1873_v42, %v465_v59  ;;  %v623_v23 = vmul.f32 %v1877_v45, %v1821_v5  ;;  %v671_v27 = vmul.f32 %v1884_v49, %v1911_v63 }
  0xea   : > { %v451_v25 = vrot.slane %v422_v16, 7  ;;  %v457_v26 = vrot.slane %v423_v17, 7  ;;  %v494_v31 = vrot.slane %v422_v16, 1  ;;  %v500_v32 = vrot.slane %v423_v17, 1 }
  0xeb   : > { %v562_v44 = vmul.f32 %v1865_v38, %v422_v16  ;;  %v710_v14 = vadd.f32 %v702_v62, %v690_v0  ;;  %v563_v18 = vmul.f32 %v1865_v38, %v423_v17  ;;  %v683_v17 = vmul.f32 %v1886_v50, %v1830_v10 }
  0xec   : > { %v470_v34 = vsel %vm463_vm1, %v457_v26, %v451_v25  ;;  %v507_v40 = vsel %vm506_vm2, %v494_v31, %v500_v32  ;;  %v464_v58 = vsel %vm463_vm1, %v451_v25, %v457_v26  ;;  %v513_v2 = vsel %vm506_vm2, %v500_v32, %v494_v31 }
  0xed   : > { %v480_v39 = vsel %vm449_vm0, %v470_v34, 0.0  ;;  %v582_v47 = vmul.f32 %v1871_v41, %v507_v40  ;;  %v524_v12 = vsel %vm493_vm3, %v513_v2, 0.0  ;;  %v551_v16 = vmul.f32 %v1863_v37, %v464_v58 }
  0xee   : > { %v550_v43 = vmul.f32 %v1863_v37, %v480_v39  ;;  %v583_v21 = vmul.f32 %v1871_v41, %v524_v12  ;;  %v643_v26 = vmul.f32 %v1879_v46, %v526_v13  ;;  %v631_v31 = vadd.f32 %v623_v23, %v611_v22 }
  0xef   : > { %v571_v25 = vadd.f32 %v563_v18, %v551_v16  ;;  %v703_v32 = vmul.f32 %v1892_v54, %v1926_v15  ;;  %v454_v34 = vrot.slane %v1931_v19, 7  ;;  %v691_v39 = vadd.f32 %v683_v17, %v671_v27  ;;  %v2006_v27 = vld [vmem:[%s1781_s0 + $0x30] sm:$0xff]  ;;  %v2009_v17 = vld [vmem:[%s1781_s0 + $0x38] sm:$0xff]  ;;  %s751_s0 = sshll.u32 %s1952_s30, 4  ;;  %s2132_s0 = int_to_ptr.vmem [resolvable:$true] %s751_s0 }
  0xf0   : > { %v570_v51 = vadd.f32 %v562_v44, %v550_v43  ;;  %v460_v40 = vrot.slane %v1938_v24, 7  ;;  %v497_v43 = vrot.slane %v1931_v19, 1  ;;  %v651_v44 = vadd.f32 %v643_v26, %v631_v31  ;;  %s1220_s4 = scalar_lea.vmem %s2132_s0, 1024 }
  0xf1   : > { %v591_v36 = vadd.f32 %v583_v21, %v571_v25  ;;  %v552_v48 = vmul.f32 %v1863_v37, %v1847_v28  ;;  %v711_v53 = vadd.f32 %v703_v32, %v691_v39  ;;  %v584_v57 = vmul.f32 %v1871_v41, %v1855_v33  ;;  %p1221_p13 = scmp.ne.s32.totalorder %s2132_s0, %s1220_s4 }
  0xf2   : > { %v590_v60 = vadd.f32 %v582_v47, %v570_v51  ;;  %v503_v47 = vrot.slane %v1938_v24, 1  ;;  %v564_v51 = vmul.f32 %v1865_v38, %v1818_v4  ;;  %v473_v56 = vsel %vm463_vm1, %v460_v40, %v454_v34 }
  0xf3   : > { %v599_v52 = vadd.f32 %v1897_v55, %v591_v36  ;;  %v1967_v58 = vsel %vm449_vm0, %v473_v56, 0.0  ;;  %v612_v4 = vmul.f32 %v1873_v42, %v1851_v30  ;;  %v624_v62 = vmul.f32 %v1877_v45, %v1824_v6  ;;  %p1222_p8 = pnand %p1221_p13, %p2313_p12 }
  0xf4   : > { %v598_v9 = vadd.f32 %v1897_v55, %v590_v60  ;;  %v1971_v60 = vsel %vm506_vm2, %v497_v43, %v503_v47  ;;  %v572_v28 = vadd.f32 %v564_v51, %v552_v48  ;;  %v644_v33 = vmul.f32 %v1879_v46, %v1861_v35 }
  0xf5   : > { %v659_v61 = vadd.f32 %v651_v44, %v599_v52  ;;  %v672_v0 = vmul.f32 %v1884_v49, %v1967_v58  ;;  %v684_v7 = vmul.f32 %v1886_v50, %v1931_v19  ;;  %v704_v8 = vmul.f32 %v1892_v54, %v1971_v60  ;;  %p1223_p11 = pneg %p1222_p8 }
  0xf6   : > { %v658_v20 = vadd.f32 %v650_v11, %v598_v9  ;;  %v592_v2 = vadd.f32 %v584_v57, %v572_v28  ;;  %v1987_v9 = vsel %vm463_vm1, %v454_v34, %v460_v40  ;;  %v632_v12 = vadd.f32 %v624_v62, %v612_v4 }
  0xf7   : > { %v719_v11 = vadd.f32 %v711_v53, %v659_v61  ;;  %v553_v16 = vmul.f32 %v1863_v37, %v465_v59  ;;  %v565_v22 = vmul.f32 %v1865_v38, %v1821_v5  ;;  %v585_v25 = vmul.f32 %v1871_v41, %v526_v13 }
  0xf8   : > { %v718_v29 = vadd.f32 %v710_v14, %v658_v20  ;;  %v516_v14 = vsel %vm506_vm2, %v503_v47, %v497_v43  ;;  %v600_v18 = vadd.f32 %v1897_v55, %v592_v2  ;;  %v692_v20 = vadd.f32 %v684_v7, %v672_v0 }
  0xf9   : > { %v1995_v21 = vsel %vm493_vm3, %v516_v14, 0.0  ;;  %727 = vst [vmem:[%s1952_s30 + $0x8] sm:$0xff] %v719_v11  ;;  %v652_v23 = vadd.f32 %v644_v33, %v632_v12  ;;  %v613_v26 = vmul.f32 %v1873_v42, %v1911_v63  ;;  %v625_v59 = vmul.f32 %v1877_v45, %v1830_v10 }
  0xfa   : > { %726 = vst [vmem:[%s1952_s30] sm:$0xff] %v718_v29  ;;  %v712_v29 = vadd.f32 %v704_v8, %v692_v20  ;;  %v573_v31 = vadd.f32 %v565_v22, %v553_v16  ;;  %v645_v5 = vmul.f32 %v1879_v46, %v1926_v15  ;;  %v673_v32 = vmul.f32 %v1884_v49, %v1987_v9 }
  0xfb   : > { %v660_v34 = vadd.f32 %v652_v23, %v600_v18  ;;  %v633_v13 = vadd.f32 %v625_v59, %v613_v26  ;;  %v685_v36 = vmul.f32 %v1886_v50, %v1938_v24  ;;  %v705_v39 = vmul.f32 %v1892_v54, %v1995_v21 }
  0xfc   : > { %v593_v40 = vadd.f32 %v585_v25, %v573_v31  ;;  %v455_v43 = vrot.slane %v2006_v27, 7  ;;  %v461_v44 = vrot.slane %v2009_v17, 7  ;;  %v498_v47 = vrot.slane %v2006_v27, 1 }
  0xfd   : > { %v720_v48 = vadd.f32 %v712_v29, %v660_v34  ;;  %v653_v51 = vadd.f32 %v645_v5, %v633_v13  ;;  %v693_v52 = vadd.f32 %v685_v36, %v673_v32  ;;  %v504_v53 = vrot.slane %v2009_v17, 1  ;;  %v427_v36 = vld [vmem:[%s345_s23 + $0x8] sm:$0xff] }
  0xfe   : > { %v601_v56 = vadd.f32 %v1897_v55, %v593_v40  ;;  %v474_v57 = vsel %vm463_vm1, %v461_v44, %v455_v43  ;;  %v554_v28 = vmul.f32 %v1863_v37, %v1851_v30  ;;  %v566_v4 = vmul.f32 %v1865_v38, %v1824_v6 }
  0xff   : > { %728 = vst [vmem:[%s1952_s30 + $0x10] sm:$0xff] %v720_v48  ;;  %v713_v61 = vadd.f32 %v705_v39, %v693_v52  ;;  %v488_v62 = vsel %vm449_vm0, %v474_v57, 0.0  ;;  %v511_v33 = vsel %vm506_vm2, %v498_v47, %v504_v53  ;;  %v586_v0 = vmul.f32 %v1871_v41, %v1861_v35 }
 0x100   : > { %v661_v2 = vadd.f32 %v653_v51, %v601_v56  ;;  %v574_v30 = vadd.f32 %v566_v4, %v554_v28  ;;  %v614_v6 = vmul.f32 %v1873_v42, %v1967_v58  ;;  %v626_v7 = vmul.f32 %v1877_v45, %v1931_v19 }
 0x101   : > { %v646_v8 = vmul.f32 %v1879_v46, %v1971_v60  ;;  %v674_v11 = vmul.f32 %v1884_v49, %v488_v62  ;;  %v686_v35 = vmul.f32 %v1886_v50, %v2006_v27  ;;  %v706_v12 = vmul.f32 %v1892_v54, %v511_v33 }
 0x102   : > { %v721_v14 = vadd.f32 %v713_v61, %v661_v2  ;;  %v594_v16 = vadd.f32 %v586_v0, %v574_v30  ;;  %v634_v18 = vadd.f32 %v626_v7, %v614_v6  ;;  %v2054_v20 = vsel %vm463_vm1, %v455_v43, %v461_v44 }
 0x103   : > { %v694_v22 = vadd.f32 %v686_v35, %v674_v11  ;;  %v517_v23 = vsel %vm506_vm2, %v504_v53, %v498_v47  ;;  %v555_v25 = vmul.f32 %v1863_v37, %v1911_v63  ;;  %v567_v26 = vmul.f32 %v1865_v38, %v1830_v10  ;;  %v426_v10 = vld [vmem:[%s345_s23] sm:$0xff]  ;;  %s1224_s23 = sshll.u32 %s1388_s7, 4  ;;  %s1225_s23 = int_to_ptr.vmem [resolvable:$false] %s1224_s23 }
 0x104   : > { %729 = vst [vmem:[%s1952_s30 + $0x18] sm:$0xff] %v721_v14  ;;  %v602_v59 = vadd.f32 %v1897_v55, %v594_v16  ;;  %v654_v29 = vadd.f32 %v646_v8, %v634_v18  ;;  %v532_v31 = vsel %vm493_vm3, %v517_v23, 0.0  ;;  %v587_v5 = vmul.f32 %v1871_v41, %v1926_v15  ;;  %s1226_s8 = scalar_lea.vmem %s1225_s23, 2048  ;;  %p1227_p6 = scmp.lt.s32.totalorder %s2132_s0, %s1225_s23 }
 0x105   : > { %v714_v32 = vadd.f32 %v706_v12, %v694_v22  ;;  %v575_v34 = vadd.f32 %v567_v26, %v555_v25  ;;  %v615_v13 = vmul.f32 %v1873_v42, %v1987_v9  ;;  %v627_v63 = vmul.f32 %v1877_v45, %v1938_v24  ;;  %p1228_p2 = scmp.lt.s32.totalorder %s1226_s8, %s1220_s4 }
 0x106   : > { %v662_v39 = vadd.f32 %v654_v29, %v602_v59  ;;  %v647_v40 = vmul.f32 %v1879_v46, %v1995_v21  ;;  %v675_v15 = vmul.f32 %v1884_v49, %v2054_v20  ;;  %v687_v43 = vmul.f32 %v1886_v50, %v2009_v17 }
 0x107   : > { %v595_v44 = vadd.f32 %v587_v5, %v575_v34  ;;  %v635_v47 = vadd.f32 %v627_v63, %v615_v13  ;;  %v707_v48 = vmul.f32 %v1892_v54, %v532_v31  ;;  %v428_v51 = vstv %s401_s17  ;;  %p1229_p3 = por %p1228_p2, %p1227_p6 }
 0x108   : > { %v722_v52 = vadd.f32 %v714_v32, %v662_v39  ;;  %v695_v53 = vadd.f32 %v687_v43, %v675_v15  ;;  %v429_v56 = vmul.f32 %v428_v51, %v426_v10  ;;  %v430_v57 = vmul.f32 %v428_v51, %v427_v36 }
 0x109   : > { %v603_v28 = vadd.f32 %v1897_v55, %v595_v44  ;;  %v655_v4 = vadd.f32 %v647_v40, %v635_v47  ;;  %v556_v61 = vmul.f32 %v1863_v37, %v1967_v58  ;;  %v568_v0 = vmul.f32 %v1865_v38, %v1931_v19  ;;  %p1230_p0 = pnand %p1229_p3, %p1223_p11 }
 0x10a   : > { %730 = vst [vmem:[%s1952_s30 + $0x20] sm:$0xff] %v722_v52  ;;  %v715_v2 = vadd.f32 %v707_v48, %v695_v53  ;;  %v456_v30 = vrot.slane %v429_v56, 7  ;;  %v462_v6 = vrot.slane %v430_v57, 7  ;;  %v499_v7 = vrot.slane %v429_v56, 1 }
 0x10b   : > { %v663_v8 = vadd.f32 %v655_v4, %v603_v28  ;;  %v505_v11 = vrot.slane %v430_v57, 1  ;;  %v576_v35 = vadd.f32 %v568_v0, %v556_v61  ;;  %v588_v12 = vmul.f32 %v1871_v41, %v1971_v60 }
 0x10c   : > { %v475_v14 = vsel %vm463_vm1, %v462_v6, %v456_v30  ;;  %v616_v58 = vmul.f32 %v1873_v42, %v488_v62  ;;  %v628_v19 = vmul.f32 %v1877_v45, %v2006_v27  ;;  %v648_v16 = vmul.f32 %v1879_v46, %v511_v33 }
 0x10d   : > { %v723_v18 = vadd.f32 %v715_v2, %v663_v8  ;;  %v490_v22 = vsel %vm449_vm0, %v475_v14, 0.0  ;;  %v512_v23 = vsel %vm506_vm2, %v499_v7, %v505_v11  ;;  %v596_v25 = vadd.f32 %v588_v12, %v576_v35 }
 0x10e   : > { %v636_v26 = vadd.f32 %v628_v19, %v616_v58  ;;  %v676_v60 = vmul.f32 %v1884_v49, %v490_v22  ;;  %v688_v59 = vmul.f32 %v1886_v50, %v429_v56  ;;  %v708_v62 = vmul.f32 %v1892_v54, %v512_v23 }
 0x10f   : > { %731 = vst [vmem:[%s1952_s30 + $0x28] sm:$0xff] %v723_v18  ;;  %v604_v27 = vadd.f32 %v1897_v55, %v596_v25  ;;  %v469_v33 = vsel %vm463_vm1, %v456_v30, %v462_v6  ;;  %v518_v29 = vsel %vm506_vm2, %v505_v11, %v499_v7  ;;  %v557_v5 = vmul.f32 %v1863_v37, %v1987_v9 }
 0x110   : > { %v656_v32 = vadd.f32 %v648_v16, %v636_v26  ;;  %v696_v34 = vadd.f32 %v688_v59, %v676_v60  ;;  %v534_v13 = vsel %vm493_vm3, %v518_v29, 0.0  ;;  %v569_v63 = vmul.f32 %v1865_v38, %v1938_v24 }
 0x111   : > { %v589_v10 = vmul.f32 %v1871_v41, %v1995_v21  ;;  %v617_v36 = vmul.f32 %v1873_v42, %v2054_v20  ;;  %v629_v1 = vmul.f32 %v1877_v45, %v2009_v17  ;;  %v649_v37 = vmul.f32 %v1879_v46, %v532_v31 }
 0x112   : > { %v664_v3 = vadd.f32 %v656_v32, %v604_v27  ;;  %v716_v9 = vadd.f32 %v708_v62, %v696_v34  ;;  %v577_v39 = vadd.f32 %v569_v63, %v557_v5  ;;  %v677_v38 = vmul.f32 %v1884_v49, %v469_v33 }
 0x113   : > { %v637_v24 = vadd.f32 %v629_v1, %v617_v36  ;;  %v689_v41 = vmul.f32 %v1886_v50, %v430_v57  ;;  %v709_v21 = vmul.f32 %v1892_v54, %v534_v13 }
 0x114   : > { %v724_v42 = vadd.f32 %v716_v9, %v664_v3  ;;  %v597_v20 = vadd.f32 %v589_v10, %v577_v39 }
 0x115   : > { %v657_v45 = vadd.f32 %v649_v37, %v637_v24  ;;  %v697_v46 = vadd.f32 %v689_v41, %v677_v38 }
 0x116   : > { %732 = vst [vmem:[%s1952_s30 + $0x30] sm:$0xff] %v724_v42  ;;  %v605_v17 = vadd.f32 %v1897_v55, %v597_v20 }
 0x117   : > { %v717_v31 = vadd.f32 %v709_v21, %v697_v46 }
 0x118   : > { %v665_v49 = vadd.f32 %v657_v45, %v605_v17 }
 0x11a   : > { %v725_v50 = vadd.f32 %v717_v31, %v665_v49 }
 0x11c   : > { %733 = vst [vmem:[%s1952_s30 + $0x38] sm:$0xff] %v725_v50 }
 0x11d   : > { %1233 = shalt.err (!%p1230_p0)
}
 0x11e   : > { %s1234_s26 = scalar_lea.hbm %s2137_s18, 1024  ;;  %s1238_s15 = scalar_lea.hbm %s2312_s14, 8192 }
 0x11f   : > { %p1235_p9 = scmp.ne.s32.totalorder %s2137_s18, %s1234_s26  ;;  %p1239_p10 = scmp.lt.u32.totalorder %s2137_s18, %s2312_s14 }
 0x120   : > { %p1240_p7 = scmp.lt.u32.totalorder %s1238_s15, %s1234_s26  ;;  %p1242_p13 = scmp.lt.u32.totalorder %s1234_s26, %s2137_s18 }
 0x121   : > { %p1236_p5 = pnand %p1235_p9, %p2313_p12 }
 0x122   : > { %p1241_p1 = por %p1240_p7, %p1239_p10 }
 0x123   : > { %p1237_p4 = pneg %p1236_p5 }
 0x124   : > { %p1243_p8 = por %p1242_p13, %p1241_p1 }
 0x126   : > { %p1244_p11 = pnand %p1243_p8, %p1237_p4 }
 0x128   : > { %1247 = shalt.err (!%p1244_p11)
}
 0x129   : > { %s1389_s3 = smov 128   ;;  %s1390_s17 = smov 8  }
 0x12a   : > { %959 = dma.vmem_to_hbm [thread:$0]  (%p2313_p12), %s2132_s0, 1024, %s2137_s18, %s735_s20, %s1389_s3, %s1389_s3, %s1390_s17  }
 0x12b PF: > { %s2314_s1 = sld [smem:[#allocation32_spill]]  ;;  %p982_p6 = scmp.ge.s32.totalorder %s1378_s6, 2 }
 0x12c   : > { %s766_s27 = sand.u32 1, %s1350_s24  }
 0x12d   : > { %s767_s12 = scalar_lea.sflag [#allocation5], %s766_s27 }
 0x131   : > { %p2315_p2 = scmp.ne.s32.totalorder %s2314_s1, 0 }
 0x133   : > { %p976_p3 = pnand %p982_p6, %p2315_p2 }
 0x135   : > { %1321 = dma.done.wait (!%p976_p3), %s767_s12, 1024  }
 0x136   : > { %1323 = vsyncadd (!%p976_p3), %s767_s12, 4294966272  ;;  %s25_s6 = sadd.s32 1, %s1378_s6   ;;  %s2317_s18 = sld [smem:[#allocation18_spill]] }
 0x137   : > { %p2169_p0 = scmp.ge.s32.totalorder %s25_s6, 10   ;;  %s2318_s19 = sld [smem:[#allocation19_spill]] }
 0x138   : > { %s2319_s13 = sld [smem:[#allocation20_spill]]  ;;  %s2320_s23 = sld [smem:[#allocation30_spill]] }
 0x139   : > { %s2321_s10 = sld [smem:[#allocation21_spill]]  ;;  %s2322_s26 = sld [smem:[#allocation31_spill]] }
 0x13a   : > { %s2323_s27 = sld [smem:[#allocation24_spill]]  ;;  %s2324_s28 = sld [smem:[#allocation25_spill]] }
 0x13b   : > { %s2325_s29 = sld [smem:[#allocation26_spill]]  ;;  %s2326_s30 = sld [smem:[#allocation27_spill]] }
 0x13c   : > { %s2327_s20 = smov %s2347_s9  ;;  %s2328_s21 = smov %s1342_s22 }
 0x13d   : > { %s2330_s24 = smov %s1354_s25  ;;  %24 = sbr.rel (!%p2169_p0) target bundleno = 20 (0x14), region = 115 }
 0x13e   : > { %s2329_s22 = smov %s2319_s13 }
 0x13f   : > { %s2331_s25 = smov %s2321_s10 }
 0x144   :  { %772 = vsyncpa [#allocation4], 1 }
 0x145   :  { %774 = vsyncpa [#allocation4 + $0x1], 1 }
 0x146   :  { %775 = vsyncpa [#allocation7], 1 }
 0x147   :  { %777 = vsyncpa [#allocation7 + $0x1], 1 }
 0x148   :  { %778 = vsyncpa [#allocation10], 1 }
 0x149   :  { %779 = vsyncpa [#allocation5], 1 }
 0x14a   :  { %781 = vsyncpa [#allocation5 + $0x1], 1 }

</bundles_post_ra>
